<compile_context>
chip_gen: v5e
topology: v5e:2x2
jax: 0.10.0
libtpu: 0.0.40
codegen_flags: <defaults>
</compile_context>

<pallas_src>
import math
from functools import partial

import jax
import jax.numpy as jnp
from jax.experimental import pallas as pl
from jax.experimental.pallas import tpu as pltpu


def _sa_pass1_kernel(x_ref, nf_ref, wsm_ref, bsm_ref, wkv_ref, bkv_ref,
                     y_ref, stats_ref, *, n_valid):
    """Per-tile: Q / K / (wc^T V) projections + attention + folded 1x1 conv.

    Emits y (pre-BN features, channels-first) and masked BN partial sums.
    """
    C, TN = x_ref.shape
    KC = nf_ref.shape[0]
    K = KC // C

    x = x_ref[...].astype(jnp.float32)            # (C, TN)   channels on sublanes
    nf = nf_ref[...].astype(jnp.float32)          # (K*C, TN)

    # Fused small projection on x: rows [0,C) -> Q, rows [C,2C) -> wc^T x + bc.
    sm = jnp.dot(wsm_ref[...], x, preferred_element_type=jnp.float32) + bsm_ref[...]
    q = sm[:C, :]                                  # (C, TN)
    cx = sm[C:, :]                                 # (C, TN)  = wc^T x + bc

    # Fused K / (wc^T V) projection: ONE MXU pass over nf with a block-diagonal
    # (2*K*C, K*C) weight.
    #   rows [0, K*C)      -> Kp[n, k, :]          at rows k*C .. k*C+C
    #   rows [K*C, 2*K*C)  -> (wc^T V)[n, k, :]    at rows K*C + k*C ..
    kv = jnp.dot(wkv_ref[...], nf, preferred_element_type=jnp.float32) + bkv_ref[...]

    inv_d = jnp.float32(1.0 / math.sqrt(C))

    # logits_k[n] = sum_c Kp[n,k,c] * Q[n,c] / sqrt(C)  -- K cheap sublane (XLU)
    # reductions, kept as separate (1, TN) rows (no 3-D intermediates).
    logit_rows = []
    for k in range(K):
        kp_k = kv[k * C:(k + 1) * C, :]                                   # (C, TN)
        logit_rows.append(jnp.sum(kp_k * q, axis=0, keepdims=True) * inv_d)

    # Numerically-stable softmax over the K rows.
    m = logit_rows[0]
    for k in range(1, K):
        m = jnp.maximum(m, logit_rows[k])
    exp_rows = [jnp.exp(r - m) for r in logit_rows]
    den = exp_rows[0]
    for k in range(1, K):
        den = den + exp_rows[k]
    inv_den = pl.reciprocal(den, approx=True)                             # (1, TN)

    # Unnormalized wc^T attention_feature; normalize once at the end.
    af = exp_rows[0] * kv[KC:KC + C, :]
    for k in range(1, K):
        af = af + exp_rows[k] * kv[KC + k * C:KC + (k + 1) * C, :]

    # y = wc^T (x - attention_feature) + bc, with wc already folded into V.
    y = cx - af * inv_den                                                 # (C, TN)
    y_ref[...] = y

    # Masked partial sums for the global training-mode BatchNorm statistics
    # (mask out lanes that only exist because N was padded to a tile multiple).
    lane = jax.lax.broadcasted_iota(jnp.int32, (1, TN), 1)
    valid = (pl.program_id(0) * TN + lane) < n_valid                      # (1, TN)
    ym = jnp.where(valid, y, 0.0)
    s1 = jnp.sum(ym, axis=1, keepdims=True)                               # (C, 1)
    s2 = jnp.sum(ym * ym, axis=1, keepdims=True)                          # (C, 1)
    stats_ref[...] = jnp.concatenate([s1, s2], axis=0)[None, :, :]        # (1, 2C, 1)


def _sa_pass2_kernel(x_ref, y_ref, ab_ref, out_ref):
    """Per-tile: folded BatchNorm (y*scale + shift) + ReLU + residual add."""
    x = x_ref[...].astype(jnp.float32)        # (C, TN)
    y = y_ref[...]                            # (C, TN) f32
    ab = ab_ref[...]                          # (2, C, 1): [scale ; shift]
    yn = y * ab[0] + ab[1]
    out_ref[...] = x + jnp.maximum(yn, 0.0)


def knn_transformer_forward(x, new_xyz, new_feature, params, *,
                            tile_n=256, feature_dtype=jnp.float32):
    """x: (N, C) point features, new_feature: (N, K, C) knn features. Returns (N, C).

    tile_n: lane-tile along N (>=128).  256 keeps the fused (2KC, tile_n) MXU
            result comfortably inside the vreg file while giving >=64 KiB DMAs
            on the dominant nf stream; raise it for very large N on v5e/v6e.
    feature_dtype: HBM storage dtype for x / new_feature (bf16 halves HBM traffic
            on v6e/v7x; the kernel always computes in f32).
    """
    del new_xyz  # only carries coordinates in the original module
    N, C = x.shape
    K = new_feature.shape[1]
    KC = K * C

    tile_n = max(128, int(tile_n))
    n_tiles = pl.cdiv(N, tile_n)
    n_pad = n_tiles * tile_n

    # ---- layout plumbing (wrapper-side): channels-first, N on the lane axis ----
    xT = jnp.zeros((C, n_pad), feature_dtype).at[:, :N].set(x.T.astype(feature_dtype))
    nfT = jnp.zeros((KC, n_pad), feature_dtype).at[:, :N].set(
        new_feature.transpose(1, 2, 0).reshape(KC, N).astype(feature_dtype))

    # ---- pack parameters into a few resident blocks (wc folded into V) ----
    f32 = jnp.float32
    wq = params["wq"].astype(f32)
    wk = params["wk"].astype(f32)
    wv = params["wv"].astype(f32)
    wc = params["wc"].astype(f32)                      # (in, out)
    bq = params["bq"].reshape(C, 1).astype(f32)
    bc = params["bc"].reshape(C, 1).astype(f32)
    bk = params["bk"].reshape(C, 1).astype(f32)
    bv = params["bv"].reshape(C, 1).astype(f32)
    gamma = params["gamma"].reshape(-1).astype(f32)
    beta = params["beta"].reshape(-1).astype(f32)

    wcT = wc.T                                         # (out, in)
    w_small = jnp.concatenate([wq, wcT], axis=0)       # (2C, C): [Q ; wc^T x]
    b_small = jnp.concatenate([bq, bc], axis=0)        # (2C, 1)

    eye_k = jnp.eye(K, dtype=f32)
    wvc = wcT @ wv                                     # fold 1x1 conv into V proj
    bvc = wcT @ bv                                     # (C, 1)
    wkv = jnp.concatenate([jnp.kron(eye_k, wk), jnp.kron(eye_k, wvc)], axis=0)  # (2KC, KC)
    bkv = jnp.concatenate([jnp.tile(bk, (K, 1)), jnp.tile(bvc, (K, 1))], axis=0)  # (2KC, 1)

    grid = (n_tiles,)
    tile_spec = lambda rows: pl.BlockSpec((rows, tile_n), lambda i: (0, i))
    full_spec = lambda a: pl.BlockSpec(a.shape, lambda i: (0,) * a.ndim)
    cparams = pltpu.CompilerParams(dimension_semantics=("parallel",))

    # ---- pass 1: projections + attention + folded 1x1 conv, BN partial sums ----
    y_all, stats = pl.pallas_call(
        partial(_sa_pass1_kernel, n_valid=N),
        grid=grid,
        in_specs=[tile_spec(C), tile_spec(KC),
                  full_spec(w_small), full_spec(b_small),
                  full_spec(wkv), full_spec(bkv)],
        out_specs=(tile_spec(C),
                   pl.BlockSpec((1, 2 * C, 1), lambda i: (i, 0, 0))),
        out_shape=(jax.ShapeDtypeStruct((C, n_pad), jnp.float32),
                   jax.ShapeDtypeStruct((n_tiles, 2 * C, 1), jnp.float32)),
        compiler_params=cparams,
    )(xT, nfT, w_small, b_small, wkv, bkv)

    # ---- global training-mode BatchNorm statistics (tiny, plain JAX glue) ----
    sums = jnp.sum(stats[:, :, 0], axis=0)            # (2C,)
    mu = sums[:C] / N
    msq = sums[C:] / N
    var = msq - mu * mu                                # biased variance (train mode)
    scale = gamma * jax.lax.rsqrt(var + 1e-5)
    shift = beta - mu * scale
    ab = jnp.stack([scale, shift], axis=0).reshape(2, C, 1)

    # ---- pass 2: normalize + ReLU + residual ----
    out_t = pl.pallas_call(
        _sa_pass2_kernel,
        grid=grid,
        in_specs=[tile_spec(C), tile_spec(C), full_spec(ab)],
        out_specs=tile_spec(C),
        out_shape=jax.ShapeDtypeStruct((C, n_pad), jnp.float32),
        compiler_params=cparams,
    )(xT, y_all, ab)

    return out_t[:, :N].T


def _reference(x, new_feature, params):
    """Plain-JAX reference for sanity checking (semantics of SA_Layer.forward)."""
    C = x.shape[-1]
    Q = x @ params["wq"].T + params["bq"]
    Kp = new_feature @ params["wk"].T + params["bk"]
    V = new_feature @ params["wv"].T + params["bv"]
    logits = jnp.einsum("nkc,nc->nk", Kp, Q) / math.sqrt(C)
    attn = jax.nn.softmax(logits, axis=-1)
    att_feat = jnp.einsum("nk,nkc->nc", attn, V)
    y = (x - att_feat) @ params["wc"] + params["bc"]
    mu = jnp.mean(y, axis=0, keepdims=True)
    var = jnp.mean((y - mu) ** 2, axis=0, keepdims=True)
    y = (y - mu) / jnp.sqrt(var + 1e-5) * params["gamma"] + params["beta"]
    return x + jnp.maximum(y, 0.0)


if __name__ == "__main__":
    # points, knn neighbors, channels (knn_Transformer default channels=8);
    # N is deliberately not a tile multiple so the padding/masking path is exercised.
    N, K, C = 300, 8, 8

    key = jax.random.PRNGKey(0)
    ks = jax.random.split(key, 10)
    x = jax.random.normal(ks[0], (N, C), dtype=jnp.float32)
    new_xyz = jax.random.normal(ks[1], (N, 3), dtype=jnp.float32)
    new_feature = jax.random.normal(ks[2], (N, K, C), dtype=jnp.float32)

    s = 1.0 / math.sqrt(C)
    params = {
        "wq": jax.random.normal(ks[3], (C, C), jnp.float32) * s,
        "bq": jax.random.normal(ks[4], (1, C), jnp.float32) * 0.1,
        "wk": jax.random.normal(ks[5], (C, C), jnp.float32) * s,
        "bk": jax.random.normal(ks[6], (1, C), jnp.float32) * 0.1,
        "wv": jax.random.normal(ks[7], (C, C), jnp.float32) * s,
        "bv": jax.random.normal(ks[8], (1, C), jnp.float32) * 0.1,
        "wc": jax.random.normal(ks[9], (C, C), jnp.float32) * s,  # 1x1 Minkowski conv kernel (in, out)
        "bc": jnp.zeros((1, C), jnp.float32),
        "gamma": jnp.ones((1, C), jnp.float32),
        "beta": jnp.zeros((1, C), jnp.float32),
    }

    # TODO(synk): Minkowski sparse-tensor coordinate bookkeeping (coordinate_map_key /
    # coordinate_manager) has no Pallas equivalent; features-only forward is implemented.
    out = knn_transformer_forward(x, new_xyz, new_feature, params, tile_n=128)
    out = jax.block_until_ready(out)

    ref = _reference(x, new_feature, params)
    assert out.shape == (N, C)
    assert jnp.allclose(out, ref, rtol=1e-2, atol=1e-2), "mismatch vs JAX reference"

    print("KERNEL_OK")
</pallas_src>

<mosaic_0001>
module attributes {stable_mosaic.version = 11 : i64} {
  func.func @_sa_pass1_kernel(%arg0: i32, %arg1: memref<8x128xf32, #tpu.memory_space<vmem>>, %arg2: memref<64x128xf32, #tpu.memory_space<vmem>>, %arg3: memref<16x8xf32, #tpu.memory_space<vmem>>, %arg4: memref<16x1xf32, #tpu.memory_space<vmem>>, %arg5: memref<128x64xf32, #tpu.memory_space<vmem>>, %arg6: memref<128x1xf32, #tpu.memory_space<vmem>>, %arg7: memref<8x128xf32, #tpu.memory_space<vmem>>, %arg8: memref<1x16x1xf32, #tpu.memory_space<vmem>>) attributes {dimension_semantics = [#tpu.dimension_semantics<parallel>], iteration_bounds = array<i64: 3>, scalar_prefetch = 0 : i64, scratch_operands = 0 : i64, tpu.core_type = #tpu.core_type<tc>, window_params = [{transform_indices = @transform_0, window_bounds = array<i64: 8, 128>}, {transform_indices = @transform_1, window_bounds = array<i64: 64, 128>}, {pipeline_mode = #tpu.pipeline_mode<synchronous>, transform_indices = @transform_2, window_bounds = array<i64: 16, 8>}, {pipeline_mode = #tpu.pipeline_mode<synchronous>, transform_indices = @transform_3, window_bounds = array<i64: 16, 1>}, {pipeline_mode = #tpu.pipeline_mode<synchronous>, transform_indices = @transform_4, window_bounds = array<i64: 128, 64>}, {pipeline_mode = #tpu.pipeline_mode<synchronous>, transform_indices = @transform_5, window_bounds = array<i64: 128, 1>}, {transform_indices = @transform_6, window_bounds = array<i64: 8, 128>}, {transform_indices = @transform_7, window_bounds = array<i64: 1, 16, 1>}]} {
    %c0 = arith.constant 0 : index
    %c0_0 = arith.constant 0 : index
    %0 = vector.load %arg1[%c0, %c0_0] : memref<8x128xf32, #tpu.memory_space<vmem>>, vector<8x128xf32>
    %c0_1 = arith.constant 0 : index
    %c0_2 = arith.constant 0 : index
    %1 = vector.load %arg2[%c0_1, %c0_2] : memref<64x128xf32, #tpu.memory_space<vmem>>, vector<64x128xf32>
    %c0_3 = arith.constant 0 : index
    %c0_4 = arith.constant 0 : index
    %2 = vector.load %arg3[%c0_3, %c0_4] : memref<16x8xf32, #tpu.memory_space<vmem>>, vector<16x8xf32>
    %cst = arith.constant dense<0.000000e+00> : vector<16x128xf32>
    %3 = tpu.matmul %2, %0, %cst {dimension_numbers = #tpu.dot_dimension_numbers<[1], [0], [0], [1], [0, 0, 1, 1], [], []>} : vector<16x8xf32>, vector<8x128xf32>, vector<16x128xf32> -> vector<16x128xf32>
    %c0_5 = arith.constant 0 : index
    %c0_6 = arith.constant 0 : index
    %4 = vector.load %arg4[%c0_5, %c0_6] : memref<16x1xf32, #tpu.memory_space<vmem>>, vector<16x1xf32>
    %5 = vector.broadcast %4 : vector<16x1xf32> to vector<16x128xf32>
    %6 = arith.addf %3, %5 : vector<16x128xf32>
    %7 = vector.extract_strided_slice %6 {offsets = [0, 0], sizes = [8, 128], strides = [1, 1]} : vector<16x128xf32> to vector<8x128xf32>
    %8 = vector.extract_strided_slice %6 {offsets = [8, 0], sizes = [8, 128], strides = [1, 1]} : vector<16x128xf32> to vector<8x128xf32>
    %c0_7 = arith.constant 0 : index
    %c0_8 = arith.constant 0 : index
    %9 = vector.load %arg5[%c0_7, %c0_8] : memref<128x64xf32, #tpu.memory_space<vmem>>, vector<128x64xf32>
    %cst_9 = arith.constant dense<0.000000e+00> : vector<128x128xf32>
    %10 = tpu.matmul %9, %1, %cst_9 {dimension_numbers = #tpu.dot_dimension_numbers<[1], [0], [0], [1], [0, 0, 1, 1], [], []>} : vector<128x64xf32>, vector<64x128xf32>, vector<128x128xf32> -> vector<128x128xf32>
    %c0_10 = arith.constant 0 : index
    %c0_11 = arith.constant 0 : index
    %11 = vector.load %arg6[%c0_10, %c0_11] : memref<128x1xf32, #tpu.memory_space<vmem>>, vector<128x1xf32>
    %12 = vector.broadcast %11 : vector<128x1xf32> to vector<128x128xf32>
    %13 = arith.addf %10, %12 : vector<128x128xf32>
    %14 = vector.extract_strided_slice %13 {offsets = [0, 0], sizes = [8, 128], strides = [1, 1]} : vector<128x128xf32> to vector<8x128xf32>
    %15 = arith.mulf %14, %7 : vector<8x128xf32>
    %cst_12 = arith.constant dense<0.000000e+00> : vector<128xf32>
    %16 = vector.multi_reduction <add>, %15, %cst_12 [0] : vector<8x128xf32> to vector<128xf32>
    %17 = vector.shape_cast %16 : vector<128xf32> to vector<1x128xf32>
    %cst_13 = arith.constant 0.353553385 : f32
    %18 = vector.broadcast %cst_13 : f32 to vector<1x128xf32>
    %19 = arith.mulf %17, %18 : vector<1x128xf32>
    %20 = vector.extract_strided_slice %13 {offsets = [8, 0], sizes = [8, 128], strides = [1, 1]} : vector<128x128xf32> to vector<8x128xf32>
    %21 = arith.mulf %20, %7 : vector<8x128xf32>
    %cst_14 = arith.constant dense<0.000000e+00> : vector<128xf32>
    %22 = vector.multi_reduction <add>, %21, %cst_14 [0] : vector<8x128xf32> to vector<128xf32>
    %23 = vector.shape_cast %22 : vector<128xf32> to vector<1x128xf32>
    %cst_15 = arith.constant 0.353553385 : f32
    %24 = vector.broadcast %cst_15 : f32 to vector<1x128xf32>
    %25 = arith.mulf %23, %24 : vector<1x128xf32>
    %26 = vector.extract_strided_slice %13 {offsets = [16, 0], sizes = [8, 128], strides = [1, 1]} : vector<128x128xf32> to vector<8x128xf32>
    %27 = arith.mulf %26, %7 : vector<8x128xf32>
    %cst_16 = arith.constant dense<0.000000e+00> : vector<128xf32>
    %28 = vector.multi_reduction <add>, %27, %cst_16 [0] : vector<8x128xf32> to vector<128xf32>
    %29 = vector.shape_cast %28 : vector<128xf32> to vector<1x128xf32>
    %cst_17 = arith.constant 0.353553385 : f32
    %30 = vector.broadcast %cst_17 : f32 to vector<1x128xf32>
    %31 = arith.mulf %29, %30 : vector<1x128xf32>
    %32 = vector.extract_strided_slice %13 {offsets = [24, 0], sizes = [8, 128], strides = [1, 1]} : vector<128x128xf32> to vector<8x128xf32>
    %33 = arith.mulf %32, %7 : vector<8x128xf32>
    %cst_18 = arith.constant dense<0.000000e+00> : vector<128xf32>
    %34 = vector.multi_reduction <add>, %33, %cst_18 [0] : vector<8x128xf32> to vector<128xf32>
    %35 = vector.shape_cast %34 : vector<128xf32> to vector<1x128xf32>
    %cst_19 = arith.constant 0.353553385 : f32
    %36 = vector.broadcast %cst_19 : f32 to vector<1x128xf32>
    %37 = arith.mulf %35, %36 : vector<1x128xf32>
    %38 = vector.extract_strided_slice %13 {offsets = [32, 0], sizes = [8, 128], strides = [1, 1]} : vector<128x128xf32> to vector<8x128xf32>
    %39 = arith.mulf %38, %7 : vector<8x128xf32>
    %cst_20 = arith.constant dense<0.000000e+00> : vector<128xf32>
    %40 = vector.multi_reduction <add>, %39, %cst_20 [0] : vector<8x128xf32> to vector<128xf32>
    %41 = vector.shape_cast %40 : vector<128xf32> to vector<1x128xf32>
    %cst_21 = arith.constant 0.353553385 : f32
    %42 = vector.broadcast %cst_21 : f32 to vector<1x128xf32>
    %43 = arith.mulf %41, %42 : vector<1x128xf32>
    %44 = vector.extract_strided_slice %13 {offsets = [40, 0], sizes = [8, 128], strides = [1, 1]} : vector<128x128xf32> to vector<8x128xf32>
    %45 = arith.mulf %44, %7 : vector<8x128xf32>
    %cst_22 = arith.constant dense<0.000000e+00> : vector<128xf32>
    %46 = vector.multi_reduction <add>, %45, %cst_22 [0] : vector<8x128xf32> to vector<128xf32>
    %47 = vector.shape_cast %46 : vector<128xf32> to vector<1x128xf32>
    %cst_23 = arith.constant 0.353553385 : f32
    %48 = vector.broadcast %cst_23 : f32 to vector<1x128xf32>
    %49 = arith.mulf %47, %48 : vector<1x128xf32>
    %50 = vector.extract_strided_slice %13 {offsets = [48, 0], sizes = [8, 128], strides = [1, 1]} : vector<128x128xf32> to vector<8x128xf32>
    %51 = arith.mulf %50, %7 : vector<8x128xf32>
    %cst_24 = arith.constant dense<0.000000e+00> : vector<128xf32>
    %52 = vector.multi_reduction <add>, %51, %cst_24 [0] : vector<8x128xf32> to vector<128xf32>
    %53 = vector.shape_cast %52 : vector<128xf32> to vector<1x128xf32>
    %cst_25 = arith.constant 0.353553385 : f32
    %54 = vector.broadcast %cst_25 : f32 to vector<1x128xf32>
    %55 = arith.mulf %53, %54 : vector<1x128xf32>
    %56 = vector.extract_strided_slice %13 {offsets = [56, 0], sizes = [8, 128], strides = [1, 1]} : vector<128x128xf32> to vector<8x128xf32>
    %57 = arith.mulf %56, %7 : vector<8x128xf32>
    %cst_26 = arith.constant dense<0.000000e+00> : vector<128xf32>
    %58 = vector.multi_reduction <add>, %57, %cst_26 [0] : vector<8x128xf32> to vector<128xf32>
    %59 = vector.shape_cast %58 : vector<128xf32> to vector<1x128xf32>
    %cst_27 = arith.constant 0.353553385 : f32
    %60 = vector.broadcast %cst_27 : f32 to vector<1x128xf32>
    %61 = arith.mulf %59, %60 : vector<1x128xf32>
    %62 = arith.maximumf %19, %25 : vector<1x128xf32>
    %63 = arith.maximumf %62, %31 : vector<1x128xf32>
    %64 = arith.maximumf %63, %37 : vector<1x128xf32>
    %65 = arith.maximumf %64, %43 : vector<1x128xf32>
    %66 = arith.maximumf %65, %49 : vector<1x128xf32>
    %67 = arith.maximumf %66, %55 : vector<1x128xf32>
    %68 = arith.maximumf %67, %61 : vector<1x128xf32>
    %69 = arith.subf %19, %68 : vector<1x128xf32>
    %70 = math.exp %69 : vector<1x128xf32>
    %71 = arith.subf %25, %68 : vector<1x128xf32>
    %72 = math.exp %71 : vector<1x128xf32>
    %73 = arith.subf %31, %68 : vector<1x128xf32>
    %74 = math.exp %73 : vector<1x128xf32>
    %75 = arith.subf %37, %68 : vector<1x128xf32>
    %76 = math.exp %75 : vector<1x128xf32>
    %77 = arith.subf %43, %68 : vector<1x128xf32>
    %78 = math.exp %77 : vector<1x128xf32>
    %79 = arith.subf %49, %68 : vector<1x128xf32>
    %80 = math.exp %79 : vector<1x128xf32>
    %81 = arith.subf %55, %68 : vector<1x128xf32>
    %82 = math.exp %81 : vector<1x128xf32>
    %83 = arith.subf %61, %68 : vector<1x128xf32>
    %84 = math.exp %83 : vector<1x128xf32>
    %85 = arith.addf %70, %72 : vector<1x128xf32>
    %86 = arith.addf %85, %74 : vector<1x128xf32>
    %87 = arith.addf %86, %76 : vector<1x128xf32>
    %88 = arith.addf %87, %78 : vector<1x128xf32>
    %89 = arith.addf %88, %80 : vector<1x128xf32>
    %90 = arith.addf %89, %82 : vector<1x128xf32>
    %91 = arith.addf %90, %84 : vector<1x128xf32>
    %92 = tpu.reciprocal %91 {approx = true} : vector<1x128xf32> -> vector<1x128xf32>
    %93 = vector.extract_strided_slice %13 {offsets = [64, 0], sizes = [8, 128], strides = [1, 1]} : vector<128x128xf32> to vector<8x128xf32>
    %94 = vector.broadcast %70 : vector<1x128xf32> to vector<8x128xf32>
    %95 = arith.mulf %94, %93 : vector<8x128xf32>
    %96 = vector.extract_strided_slice %13 {offsets = [72, 0], sizes = [8, 128], strides = [1, 1]} : vector<128x128xf32> to vector<8x128xf32>
    %97 = vector.broadcast %72 : vector<1x128xf32> to vector<8x128xf32>
    %98 = arith.mulf %97, %96 : vector<8x128xf32>
    %99 = arith.addf %95, %98 : vector<8x128xf32>
    %100 = vector.extract_strided_slice %13 {offsets = [80, 0], sizes = [8, 128], strides = [1, 1]} : vector<128x128xf32> to vector<8x128xf32>
    %101 = vector.broadcast %74 : vector<1x128xf32> to vector<8x128xf32>
    %102 = arith.mulf %101, %100 : vector<8x128xf32>
    %103 = arith.addf %99, %102 : vector<8x128xf32>
    %104 = vector.extract_strided_slice %13 {offsets = [88, 0], sizes = [8, 128], strides = [1, 1]} : vector<128x128xf32> to vector<8x128xf32>
    %105 = vector.broadcast %76 : vector<1x128xf32> to vector<8x128xf32>
    %106 = arith.mulf %105, %104 : vector<8x128xf32>
    %107 = arith.addf %103, %106 : vector<8x128xf32>
    %108 = vector.extract_strided_slice %13 {offsets = [96, 0], sizes = [8, 128], strides = [1, 1]} : vector<128x128xf32> to vector<8x128xf32>
    %109 = vector.broadcast %78 : vector<1x128xf32> to vector<8x128xf32>
    %110 = arith.mulf %109, %108 : vector<8x128xf32>
    %111 = arith.addf %107, %110 : vector<8x128xf32>
    %112 = vector.extract_strided_slice %13 {offsets = [104, 0], sizes = [8, 128], strides = [1, 1]} : vector<128x128xf32> to vector<8x128xf32>
    %113 = vector.broadcast %80 : vector<1x128xf32> to vector<8x128xf32>
    %114 = arith.mulf %113, %112 : vector<8x128xf32>
    %115 = arith.addf %111, %114 : vector<8x128xf32>
    %116 = vector.extract_strided_slice %13 {offsets = [112, 0], sizes = [8, 128], strides = [1, 1]} : vector<128x128xf32> to vector<8x128xf32>
    %117 = vector.broadcast %82 : vector<1x128xf32> to vector<8x128xf32>
    %118 = arith.mulf %117, %116 : vector<8x128xf32>
    %119 = arith.addf %115, %118 : vector<8x128xf32>
    %120 = vector.extract_strided_slice %13 {offsets = [120, 0], sizes = [8, 128], strides = [1, 1]} : vector<128x128xf32> to vector<8x128xf32>
    %121 = vector.broadcast %84 : vector<1x128xf32> to vector<8x128xf32>
    %122 = arith.mulf %121, %120 : vector<8x128xf32>
    %123 = arith.addf %119, %122 : vector<8x128xf32>
    %124 = vector.broadcast %92 : vector<1x128xf32> to vector<8x128xf32>
    %125 = arith.mulf %123, %124 : vector<8x128xf32>
    %126 = arith.subf %8, %125 : vector<8x128xf32>
    %c0_28 = arith.constant 0 : index
    %c0_29 = arith.constant 0 : index
    %127 = vector.load %arg7[%c0_28, %c0_29] : memref<8x128xf32, #tpu.memory_space<vmem>>, vector<8x128xf32>
    tpu.vector_store %arg7[%c0_28, %c0_29], %126 {strides = array<i32>} : memref<8x128xf32, #tpu.memory_space<vmem>>, vector<8x128xf32>,
    %128 = tpu.iota {dimensions = array<i32: 1>} : vector<1x128xi32>
    %c128_i32 = arith.constant 128 : i32
    %129 = arith.muli %arg0, %c128_i32 : i32
    %130 = vector.broadcast %129 : i32 to vector<1x128xi32>
    %131 = arith.addi %130, %128 : vector<1x128xi32>
    %c300_i32 = arith.constant 300 : i32
    %132 = vector.broadcast %c300_i32 : i32 to vector<1x128xi32>
    %133 = arith.cmpi slt, %131, %132 : vector<1x128xi32>
    %cst_30 = arith.constant 0.000000e+00 : f32
    %134 = vector.shape_cast %133 : vector<1x128xi1> to vector<1x128xi1>
    %135 = vector.broadcast %134 : vector<1x128xi1> to vector<8x128xi1>
    %136 = vector.broadcast %cst_30 : f32 to vector<8x128xf32>
    %137 = arith.select %135, %126, %136 : vector<8x128xi1>, vector<8x128xf32>
    %cst_31 = arith.constant dense<0.000000e+00> : vector<8xf32>
    %138 = vector.multi_reduction <add>, %137, %cst_31 [1] : vector<8x128xf32> to vector<8xf32>
    %139 = vector.shape_cast %138 : vector<8xf32> to vector<8x1xf32>
    %140 = arith.mulf %137, %137 : vector<8x128xf32>
    %cst_32 = arith.constant dense<0.000000e+00> : vector<8xf32>
    %141 = vector.multi_reduction <add>, %140, %cst_32 [1] : vector<8x128xf32> to vector<8xf32>
    %142 = vector.shape_cast %141 : vector<8xf32> to vector<8x1xf32>
    %143 = tpu.concatenate %139, %142 in 0 : vector<8x1xf32>, vector<8x1xf32> -> vector<16x1xf32>
    %144 = vector.shape_cast %143 : vector<16x1xf32> to vector<1x16x1xf32>
    %c0_33 = arith.constant 0 : index
    %c0_34 = arith.constant 0 : index
    %c0_35 = arith.constant 0 : index
    %145 = vector.load %arg8[%c0_33, %c0_34, %c0_35] : memref<1x16x1xf32, #tpu.memory_space<vmem>>, vector<1x16x1xf32>
    tpu.vector_store %arg8[%c0_33, %c0_34, %c0_35], %144 {strides = array<i32>} : memref<1x16x1xf32, #tpu.memory_space<vmem>>, vector<1x16x1xf32>,
    return
  }
  func.func @transform_0(%arg0: i32) -> (i32, i32) {
    %c0_i32 = arith.constant 0 : i32
    %c0_i32_0 = arith.constant 0 : i32
    return %c0_i32, %arg0 : i32, i32
  }
  func.func @transform_1(%arg0: i32) -> (i32, i32) {
    %c0_i32 = arith.constant 0 : i32
    %c0_i32_0 = arith.constant 0 : i32
    return %c0_i32, %arg0 : i32, i32
  }
  func.func @transform_2(%arg0: i32) -> (i32, i32) {
    %c0_i32 = arith.constant 0 : i32
    %c0_i32_0 = arith.constant 0 : i32
    %c0_i32_1 = arith.constant 0 : i32
    return %c0_i32, %c0_i32_0 : i32, i32
  }
  func.func @transform_3(%arg0: i32) -> (i32, i32) {
    %c0_i32 = arith.constant 0 : i32
    %c0_i32_0 = arith.constant 0 : i32
    %c0_i32_1 = arith.constant 0 : i32
    return %c0_i32, %c0_i32_0 : i32, i32
  }
  func.func @transform_4(%arg0: i32) -> (i32, i32) {
    %c0_i32 = arith.constant 0 : i32
    %c0_i32_0 = arith.constant 0 : i32
    %c0_i32_1 = arith.constant 0 : i32
    return %c0_i32, %c0_i32_0 : i32, i32
  }
  func.func @transform_5(%arg0: i32) -> (i32, i32) {
    %c0_i32 = arith.constant 0 : i32
    %c0_i32_0 = arith.constant 0 : i32
    %c0_i32_1 = arith.constant 0 : i32
    return %c0_i32, %c0_i32_0 : i32, i32
  }
  func.func @transform_6(%arg0: i32) -> (i32, i32) {
    %c0_i32 = arith.constant 0 : i32
    %c0_i32_0 = arith.constant 0 : i32
    return %c0_i32, %arg0 : i32, i32
  }
  func.func @transform_7(%arg0: i32) -> (i32, i32, i32) {
    %c0_i32 = arith.constant 0 : i32
    %c0_i32_0 = arith.constant 0 : i32
    %c0_i32_1 = arith.constant 0 : i32
    return %arg0, %c0_i32, %c0_i32_0 : i32, i32, i32
  }
}

</mosaic_0001>

<bundles_post_ra>
// kernel: tpu_custom_call.1
= control target key start
LH: loop header
LB: loop body
LE: loop exit
PB: predicated region body
PF: predicated region fallthrough
CT: control target
= control target key end

     0   :  { %13 = vsyncpa [#allocation4], 0  ;;  %s1382_s0 = inlined_call_operand.vmem [shape: f32[8,384], index: 0, kind: input, shape index: {}]   ;;  %s1383_s1 = inlined_call_operand.vmem [shape: f32[64,384], index: 1, kind: input, shape index: {}]   ;;  %s1384_s2 = inlined_call_operand.vmem [shape: f32[16,8], index: 2, kind: input, shape index: {}]   ;;  %s1385_s3 = inlined_call_operand.vmem [shape: f32[16,1], index: 3, kind: input, shape index: {}]   ;;  %s1386_s4 = inlined_call_operand.vmem [shape: f32[128,64], index: 4, kind: input, shape index: {}]   ;;  %s1387_s5 = inlined_call_operand.vmem [shape: f32[128,1], index: 5, kind: input, shape index: {}]   ;;  %s1388_s6 = inlined_call_operand.hbm [shape: f32[8,384], index: 6, kind: output, shape index: {0}]   ;;  %s1389_s7 = inlined_call_operand.vmem [shape: f32[3,16,1], index: 7, kind: output, shape index: {1}]  }
   0x1   :  { %15 = vsyncpa [#allocation4 + $0x1], 0  ;;  %s1138_s24 = smov 0   ;;  %s1140_s25 = smov 0  }
   0x2   :  { %s1142_s26 = smov 0   ;;  %s1144_s27 = smov 0  }
   0x3 LB: > { %s1159_s28 = sadd.s32 4294967295, %s1095_s27   ;;  %s913_s29 = sadd.s32 4294967294, %s1095_s27   ;;  %s1095_s27 = sphi %s1144_s27, %s1395_s27   ;;  %s1091_s26 = sphi %s1142_s26, %s1394_s26   ;;  %s1087_s25 = sphi %s1140_s25, %s1393_s25   ;;  %s1083_s24 = sphi %s1138_s24, %s1392_s24  }
   0x4   : > { %s1163_s30 = sadd.s32 1, %s1095_s27   ;;  %s54_s8 = sadd.s32 1, %s1091_s26 }
   0x5   : > { %s51_s9 = ssub.s32 %s1095_s27, %s1163_s30  ;;  %p61_p0 = scmp.ne.s32.totalorder %s1091_s26, %s1087_s25 }
   0x6   : > { %p52_p1 = scmp.eq.s32.totalorder %s51_s9, 0  ;;  %p62_p2 = scmp.eq.s32.totalorder %s1095_s27, 0 }
   0x7   : > { %p175_p3 = scmp.eq.s32.totalorder %s1159_s28, 2  ;;  %p180_p4 = scmp.ne.s32.totalorder %s1087_s25, %s1083_s24 }
   0x8   : > { %s1175_s10 = scalar_select %p52_p1, %s1091_s26, %s54_s8  }
   0x9   : > { %p63_p5 = por %p62_p2, %p61_p0  ;;  %p1177_p6 = por %p175_p3, %p61_p0 }
   0xa   : > { %p181_p7 = scmp.eq.s32.totalorder %s913_s29, 2  ;;  %p915_p9 = scmp.ge.s32.totalorder %s1095_s27, 3 }
   0xc   : > { %p1181_p8 = por %p181_p7, %p180_p4  ;;  %235 = sbr.rel (%p915_p9) target bundleno = 29 (0x1d), region = 32 }
  0x11   : > { %245 = sbr.rel (!%p63_p5) target bundleno = 29 (0x1d), region = 40  ;;  %s247_s13 = sand.u32 (%p63_p5), 1, %s1091_s26  }
  0x12   : > { %s917_s14 = sshll.u32 (%p63_p5), %s1095_s27, 3  ;;  %s916_s15 = sshll.u32 (%p63_p5), %s247_s13, 6 }
  0x13   : > { %s251_s18 = scalar_lea.vmem (%p63_p5), %s1383_s1, %s917_s14  ;;  %s249_s19 = scalar_lea.vmem (%p63_p5), [#allocation2], %s916_s15 }
  0x14   : > { %v294_v0 = vld [vmem:[%s251_s18] sm:$0xff] (%p63_p5)  ;;  %v296_v1 = vld [vmem:[%s251_s18 + $0x18] sm:$0xff] (%p63_p5)  ;;  %v298_v2 = vld [vmem:[%s251_s18 + $0x30] sm:$0xff] (%p63_p5) }
  0x15   : > { %295 = vst [vmem:[%s249_s19] sm:$0xff] (%p63_p5), %v294_v0  ;;  %v300_v3 = vld [vmem:[%s251_s18 + $0x48] sm:$0xff] (%p63_p5)  ;;  %v302_v4 = vld [vmem:[%s251_s18 + $0x60] sm:$0xff] (%p63_p5)  ;;  %v304_v5 = vld [vmem:[%s251_s18 + $0x78] sm:$0xff] (%p63_p5) }
  0x16   : > { %297 = vst [vmem:[%s249_s19 + $0x8] sm:$0xff] %v296_v1  ;;  %v306_v6 = vld [vmem:[%s251_s18 + $0x90] sm:$0xff]  ;;  %v308_v7 = vld [vmem:[%s251_s18 + $0xa8] sm:$0xff] }
  0x17   : > { %299 = vst [vmem:[%s249_s19 + $0x10] sm:$0xff] %v298_v2 }
  0x18   : > { %301 = vst [vmem:[%s249_s19 + $0x18] sm:$0xff] %v300_v3 }
  0x19   : > { %303 = vst [vmem:[%s249_s19 + $0x20] sm:$0xff] %v302_v4 }
  0x1a   : > { %305 = vst [vmem:[%s249_s19 + $0x28] sm:$0xff] %v304_v5 }
  0x1b   : > { %307 = vst [vmem:[%s249_s19 + $0x30] sm:$0xff] %v306_v6 }
  0x1c   : > { %309 = vst [vmem:[%s249_s19 + $0x38] sm:$0xff] %v308_v7 }
  0x1d PF: > { %p918_p10 = scmp.ge.s32.totalorder %s1095_s27, 1  ;;  %p314_p11 = scmp.lt.s32.totalorder %s1095_s27, 4 }
  0x1f   : > { %p315_p12 = pnand %p918_p10, %p314_p11 }
  0x20   : > { %s1194_s20 = sand.u32 (!%p315_p12), 1, %s1087_s25   ;;  %p361_p13 = scmp.lt.s32.totalorder (!%p315_p12), %s1159_s28, 2 }
  0x21   : > { %318 = sbr.rel (%p315_p12) target bundleno = 399 (0x18f), region = 78  ;;  %s919_s23 = sshll.u32 (!%p315_p12), %s1194_s20, 6 }
  0x22   : > { %s1207_s14 = scalar_lea.vmem (!%p315_p12), [#allocation2], %s919_s23  ;;  %s942_s13 = sshll.u32 (!%p315_p12), %s1159_s28, 7 }
  0x23   : > { %s944_s17 = sshll.u32 (!%p315_p12), %s1159_s28, 3 }
  0x24   : > { %s803_s21 = scalar_lea.hbm (!%p315_p12), %s1388_s6, %s944_s17 }
  0x26   : > { %v381_v8 = vld [vmem:[%s1385_s3] sm:$0xff]  ;;  %v1097_v9 = vmov 0   ;;  %v440_v10 = vld [vmem:[%s1387_s5 + $0x8] sm:$0xff]  ;;  %v442_v11 = vld [vmem:[%s1387_s5 + $0x18] sm:$0xff]  ;;  %s1212_s15 = scalar_select %p361_p13, %s1159_s28, 2  ;;  %vm393_vm0 = vcmask 64512  }
  0x27   : > { %1012 = vset.pattern.permute.xlu0 %v1097_v9  ;;  %1013 = vset.pattern.permute.xlu1 %v1097_v9  ;;  %v378_v12 = vld [vmem:[%s1207_s14 + $0x38] sm:$0xff]  ;;  %v377_v13 = vld [vmem:[%s1207_s14 + $0x30] sm:$0xff]  ;;  %v376_v14 = vld [vmem:[%s1207_s14 + $0x28] sm:$0xff]  ;;  %vm535_vm1 = vcmask 523264   ;;  %s788_s28 = scalar_lea.sflag [#allocation4], %s1194_s20 }
  0x28   : > { %385 = vperm.xlu0 %1012, %v381_v8   ;;  %462 = vperm.xlu1 %1013, %v440_v10   ;;  %s921_s16 = sshll.u32 %s1212_s15, 3  ;;  %v379_v15 = vld [vmem:[%s1384_s2] sm:$0xff]  ;;  %v374_v18 = vld [vmem:[%s1207_s14 + $0x18] sm:$0xff]  ;;  %v373_v19 = vld [vmem:[%s1207_s14 + $0x10] sm:$0xff] }
  0x29   : > { %1014 = vset.pattern.permute.xlu2 %v1097_v9  ;;  %948 = vmatpush.msra.mxu1 %v378_v12  ;;  %s364_s19 = scalar_lea.vmem %s1382_s0, %s921_s16  ;;  %v375_v17 = vld [vmem:[%s1207_s14 + $0x20] sm:$0xff]  ;;  %v380_v21 = vld [vmem:[%s1384_s2 + $0x8] sm:$0xff]  ;;  %v441_v23 = vld [vmem:[%s1387_s5 + $0x10] sm:$0xff]  ;;  %s920_s16 = sshll.u32 %s1194_s20, 3 }
  0x2a   : > { %949 = vmatpush.msra.mxu2 %v378_v12  ;;  %950 = vmatpush.msra.mxu3 %v378_v12  ;;  %v370_v16 = vld [vmem:[%s364_s19] sm:$0xff]  ;;  %v372_v22 = vld [vmem:[%s1207_s14 + $0x8] sm:$0xff]  ;;  %v445_v31 = vld [vmem:[%s1387_s5 + $0x30] sm:$0xff]  ;;  %s353_s22 = scalar_lea.vmem [#allocation3], %s920_s16  ;;  %s1053_s16 = scalar_lea.hbm %s1388_s6, 24 }
  0x2b   : > { %472 = vperm.xlu2 %1014, %v442_v11   ;;  %951 = vmatpush.msra.mxu1 %v377_v13  ;;  %v439_v20 = vld [vmem:[%s1387_s5] sm:$0xff]  ;;  %v444_v29 = vld [vmem:[%s1387_s5 + $0x28] sm:$0xff]  ;;  %v446_v32 = vld [vmem:[%s1387_s5 + $0x38] sm:$0xff]  ;;  %s805_s23 = sshll.u32 %s353_s22, 4  ;;  %s806_s23 = int_to_ptr.vmem [resolvable:$true] %s805_s23 }
  0x2c   : > { %952 = vmatpush.msra.mxu2 %v377_v13  ;;  %953 = vmatpush.msra.mxu3 %v377_v13  ;;  %v371_v24 = vld [vmem:[%s1207_s14] sm:$0xff]  ;;  %v428_v33 = vld [vmem:[%s1386_s4 + $0x28] sm:$0xff]  ;;  %v449_v39 = vld [vmem:[%s1387_s5 + $0x50] sm:$0xff]  ;;  %s807_s14 = sshll.u32 %s803_s21, 4  ;;  %s808_s14 = int_to_ptr.hbm [resolvable:$true] %s807_s14 }
  0x2d   : > { %415 = vmatpush.msra.mxu0 %v370_v16  ;;  %954 = vmatpush.msra.mxu1 %v376_v14  ;;  %v443_v25 = vld [vmem:[%s1387_s5 + $0x20] sm:$0xff]  ;;  %v432_v34 = vld [vmem:[%s1386_s4 + $0x48] sm:$0xff]  ;;  %v429_v40 = vld [vmem:[%s1386_s4 + $0x30] sm:$0xff]  ;;  %s1047_s29 = sshra.s32 %s808_s14, 4  ;;  %s1048_s29 = int_to_ptr.hbm [resolvable:$true] %s1047_s29 }
  0x2e   : > { %924 = vmatmul.msk.f32.vlgmr.msra.gmra.mxu0 %vm393_vm0, %v379_v15  ;;  %955 = vmatpush.msra.mxu2 %v376_v14  ;;  %v427_v26 = vld [vmem:[%s1386_s4 + $0x20] sm:$0xff]  ;;  %v436_v35 = vld [vmem:[%s1386_s4 + $0x68] sm:$0xff]  ;;  %v433_v41 = vld [vmem:[%s1386_s4 + $0x50] sm:$0xff]  ;;  %s1049_s8 = scalar_lea.hbm %s1048_s29, 8  ;;  %p1054_p3 = scmp.lt.s32.totalorder %s1048_s29, %s1388_s6 }
  0x2f   : > { %592 = vmatpush.msrb.mxu0 %v378_v12  ;;  %956 = vmatpush.msra.mxu3 %v376_v14  ;;  %v431_v27 = vld [vmem:[%s1386_s4 + $0x40] sm:$0xff]  ;;  %v424_v37 = vld [vmem:[%s1386_s4 + $0x8] sm:$0xff]  ;;  %v437_v42 = vld [vmem:[%s1386_s4 + $0x70] sm:$0xff]  ;;  %p1050_p0 = scmp.ne.s32.totalorder %s1048_s29, %s1049_s8  ;;  %p1055_p4 = scmp.lt.s32.totalorder %s1053_s16, %s1049_s8 }
  0x30   : > { %957 = vmatpush.msra.mxu1 %v375_v17  ;;  %958 = vmatpush.msra.mxu2 %v375_v17  ;;  %v435_v28 = vld [vmem:[%s1386_s4 + $0x60] sm:$0xff]  ;;  %v448_v38 = vld [vmem:[%s1387_s5 + $0x48] sm:$0xff]  ;;  %v450_v43 = vld [vmem:[%s1387_s5 + $0x58] sm:$0xff] }
  0x31   : > { %593 = vmatpush.msrb.mxu0 %v377_v13  ;;  %959 = vmatpush.msra.mxu3 %v375_v17  ;;  %v423_v30 = vld [vmem:[%s1386_s4] sm:$0xff]  ;;  %v425_v44 = vld [vmem:[%s1386_s4 + $0x10] sm:$0xff]  ;;  %v452_v46 = vld [vmem:[%s1387_s5 + $0x68] sm:$0xff]  ;;  %p1051_p1 = pnand %p1050_p0, %p1177_p6  ;;  %p1056_p5 = por %p1055_p4, %p1054_p3 }
  0x32   : > { %960 = vmatpush.msra.mxu1 %v374_v18  ;;  %961 = vmatpush.msra.mxu2 %v374_v18  ;;  %v447_v36 = vld [vmem:[%s1387_s5 + $0x40] sm:$0xff]  ;;  %v430_v47 = vld [vmem:[%s1386_s4 + $0x38] sm:$0xff]  ;;  %v453_v50 = vld [vmem:[%s1387_s5 + $0x70] sm:$0xff] }
  0x33   : > { %594 = vmatpush.msrb.mxu0 %v376_v14  ;;  %962 = vmatpush.msra.mxu3 %v374_v18  ;;  %v451_v45 = vld [vmem:[%s1387_s5 + $0x60] sm:$0xff]  ;;  %v434_v48 = vld [vmem:[%s1386_s4 + $0x58] sm:$0xff]  ;;  %v382_v53 = vld [vmem:[%s1385_s3 + $0x8] sm:$0xff]  ;;  %p1052_p2 = pneg %p1051_p1 }
  0x34   : > { %963 = vmatpush.msra.mxu1 %v373_v19  ;;  %964 = vmatpush.msra.mxu2 %v373_v19  ;;  %v438_v49 = vld [vmem:[%s1386_s4 + $0x78] sm:$0xff] }
  0x35   : > { %595 = vmatpush.msrb.mxu0 %v375_v17  ;;  %965 = vmatpush.msra.mxu3 %v373_v19  ;;  %v426_v51 = vld [vmem:[%s1386_s4 + $0x18] sm:$0xff]  ;;  %p1057_p7 = pnand %p1056_p5, %p1052_p2 }
  0x36   : > { %457 = vperm.xlu0 %1012, %v439_v20   ;;  %925 = vmatmul.msk.f32.gmra.mxu0 %vm393_vm0, %v380_v21  ;;  %v454_v52 = vld [vmem:[%s1387_s5 + $0x78] sm:$0xff] }
  0x37   : > { %596 = vmatpush.msrb.mxu0 %v374_v18  ;;  %966 = vmatpush.msra.mxu1 %v372_v22 }
  0x38   : > { %967 = vmatpush.msra.mxu2 %v372_v22  ;;  %968 = vmatpush.msra.mxu3 %v372_v22 }
  0x39   : > { %467 = vperm.xlu1 %1013, %v441_v23   ;;  %597 = vmatpush.msrb.mxu0 %v373_v19 }
  0x3a   : > { %969 = vmatpush.msra.mxu1 %v371_v24  ;;  %970 = vmatpush.msra.mxu2 %v371_v24 }
  0x3b   : > { %971 = vmatpush.msra.mxu3 %v371_v24  ;;  %477 = vperm.xlu2 %1014, %v443_v25  }
  0x3c   : > { %930 = vmatmul.msk.f32.vlgmr.msra.gmra.mxu1 %vm535_vm1, %v427_v26  ;;  %934 = vmatmul.msk.f32.vlgmr.msra.gmra.mxu2 %vm535_vm1, %v431_v27 }
  0x3d   : > { %938 = vmatmul.msk.f32.vlgmr.msra.gmra.mxu3 %vm535_vm1, %v435_v28  ;;  %598 = vmatpush.msrb.mxu0 %v372_v22 }
  0x3e   : > { %482 = vperm.xlu0 %1012, %v444_v29  }
  0x3f   : > { %599 = vmatpush.msrb.mxu0 %v371_v24 }
  0x40   : > { %926 = vmatmul.msk.f32.vlgmr.msrb.gmra.mxu0 %vm535_vm1, %v423_v30 }
  0x41   : > { %487 = vperm.xlu1 %1013, %v445_v31  }
  0x43   : > { %492 = vperm.xlu2 %1014, %v446_v32  }
  0x44   : > { %931 = vmatmul.msk.f32.gmra.mxu1 %vm535_vm1, %v428_v33  ;;  %935 = vmatmul.msk.f32.gmra.mxu2 %vm535_vm1, %v432_v34 }
  0x45   : > { %939 = vmatmul.msk.f32.gmra.mxu3 %vm535_vm1, %v436_v35 }
  0x46   : > { %497 = vperm.xlu0 %1012, %v447_v36  }
  0x48   : > { %927 = vmatmul.msk.f32.gmra.mxu0 %vm535_vm1, %v424_v37 }
  0x49   : > { %502 = vperm.xlu1 %1013, %v448_v38  }
  0x4b   : > { %507 = vperm.xlu2 %1014, %v449_v39  }
  0x4c   : > { %932 = vmatmul.msk.f32.gmra.mxu1 %vm535_vm1, %v429_v40  ;;  %936 = vmatmul.msk.f32.gmra.mxu2 %vm535_vm1, %v433_v41 }
  0x4d   : > { %940 = vmatmul.msk.f32.gmra.mxu3 %vm535_vm1, %v437_v42 }
  0x4e   : > { %512 = vperm.xlu0 %1012, %v450_v43  }
  0x50   : > { %928 = vmatmul.msk.f32.gmra.mxu0 %vm535_vm1, %v425_v44 }
  0x51   : > { %517 = vperm.xlu1 %1013, %v451_v45  }
  0x53   : > { %522 = vperm.xlu2 %1014, %v452_v46  }
  0x54   : > { %933 = vmatmul.msk.f32.gmra.mxu1 %vm535_vm1, %v430_v47  ;;  %937 = vmatmul.msk.f32.gmra.mxu2 %vm535_vm1, %v434_v48 }
  0x55   : > { %941 = vmatmul.msk.f32.gmra.mxu3 %vm535_vm1, %v438_v49 }
  0x56   : > { %527 = vperm.xlu0 %1012, %v453_v50  }
  0x58   : > { %929 = vmatmul.msk.f32.gmra.mxu0 %vm535_vm1, %v426_v51 }
  0x59   : > { %532 = vperm.xlu1 %1013, %v454_v52  }
  0x5b   : > { %390 = vperm.xlu2 %1014, %v382_v53  }
  0x85   : > { %v473_v59 = vpop.permute.xlu2 %472 }
  0x95   : > { %v478_v4 = vpop.permute.xlu2 %477 }
  0x9a   : > { %v386_v56 = vpop.permute.xlu0 %385  ;;  %v463_v57 = vpop.permute.xlu1 %462 }
  0x9d   : > { %v493_v25 = vpop.permute.xlu2 %492 }
  0xa8   : > { %v458_v61 = vpop.permute.xlu0 %457 }
  0xab   : > { %v417_v54 = vpop.f32.mrf.mxu0  ;;  %v468_v62 = vpop.permute.xlu1 %467 }
  0xac   : > { %v418_v1 = vadd.f32 %v417_v54, %v386_v56 }
  0xb0   : > { %v483_v8 = vpop.permute.xlu0 %482 }
  0xb3   : > { %v1341_v55 = vpop.f32.mrf.mxu0  ;;  %v488_v13 = vpop.permute.xlu1 %487 }
  0xb9   : > { %v613_v58 = vpop.f32.mrf.mxu1 }
  0xba   : > { %v614_v6 = vadd.f32 %v613_v58, %v478_v4 }
  0xbc   : > { %v681_v14 = vmul.f32 %v614_v6, %v418_v1 }
  0xbd   : > { %v601_v60 = vpop.f32.mrf.mxu0 }
  0xbe   : > { %v602_v63 = vadd.f32 %v601_v60, %v458_v61  ;;  %v682_v21 = vrot.slane %v681_v14, 4 }
  0xc0   : > { %v649_v2 = vmul.f32 %v602_v63, %v418_v1  ;;  %v683_v31 = vadd.f32 %v682_v21, %v681_v14 }
  0xc1   : > { %v616_v0 = vpop.f32.mrf.mxu1 }
  0xc2   : > { %v650_v9 = vrot.slane %v649_v2, 4  ;;  %v617_v11 = vadd.f32 %v616_v0, %v483_v8  ;;  %v684_v42 = vrot.slane %v683_v31, 2 }
  0xc4   : > { %v651_v17 = vadd.f32 %v650_v9, %v649_v2  ;;  %v689_v19 = vmul.f32 %v617_v11, %v418_v1  ;;  %v685_v52 = vadd.f32 %v684_v42, %v683_v31  ;;  %v503_v42 = vpop.permute.xlu1 %502 }
  0xc5   : > { %v604_v3 = vpop.f32.mrf.mxu0 }
  0xc6   : > { %v605_v5 = vadd.f32 %v604_v3, %v463_v57  ;;  %v652_v26 = vrot.slane %v651_v17, 2  ;;  %v690_v28 = vrot.slane %v689_v19, 4  ;;  %v686_v63 = vrot.slane %v685_v52, 1 }
  0xc8   : > { %v657_v7 = vmul.f32 %v605_v5, %v418_v1  ;;  %v653_v36 = vadd.f32 %v652_v26, %v651_v17  ;;  %v691_v38 = vadd.f32 %v690_v28, %v689_v19  ;;  %v687_v8 = vadd.f32 %v686_v63, %v685_v52 }
  0xc9   : > { %v619_v10 = vpop.f32.mrf.mxu1 }
  0xca   : > { %v658_v12 = vrot.slane %v657_v7, 4  ;;  %v620_v16 = vadd.f32 %v619_v10, %v488_v13  ;;  %v654_v47 = vrot.slane %v653_v36, 1  ;;  %v692_v48 = vrot.slane %v691_v38, 2 }
  0xcc   : > { %v659_v15 = vadd.f32 %v658_v12, %v657_v7  ;;  %v697_v23 = vmul.f32 %v620_v16, %v418_v1  ;;  %v655_v57 = vadd.f32 %v654_v47, %v653_v36  ;;  %v693_v58 = vadd.f32 %v692_v48, %v691_v38 }
  0xcd   : > { %v607_v18 = vpop.f32.mrf.mxu0  ;;  %v688_v16 = vmul.f32 0.35355338, %v687_v8 }
  0xce   : > { %v608_v20 = vadd.f32 %v607_v18, %v468_v62  ;;  %v660_v22 = vrot.slane %v659_v15, 2  ;;  %v698_v33 = vrot.slane %v697_v23, 4  ;;  %v694_v4 = vrot.slane %v693_v58, 1 }
  0xd0   : > { %v665_v24 = vmul.f32 %v608_v20, %v418_v1  ;;  %v661_v32 = vadd.f32 %v660_v22, %v659_v15  ;;  %v699_v44 = vadd.f32 %v698_v33, %v697_v23  ;;  %v695_v12 = vadd.f32 %v694_v4, %v693_v58  ;;  %v637_v23 = vpop.f32.mrf.mxu3 }
  0xd1   : > { %v622_v27 = vpop.f32.mrf.mxu1 }
  0xd2   : > { %v666_v29 = vrot.slane %v665_v24, 4  ;;  %v623_v30 = vadd.f32 %v622_v27, %v493_v25  ;;  %v662_v43 = vrot.slane %v661_v32, 1  ;;  %v700_v54 = vrot.slane %v699_v44, 2 }
  0xd3   : > { %v696_v20 = vmul.f32 0.35355338, %v695_v12 }
  0xd4   : > { %v667_v34 = vadd.f32 %v666_v29, %v665_v24  ;;  %v705_v35 = vmul.f32 %v623_v30, %v418_v1  ;;  %v663_v53 = vadd.f32 %v662_v43, %v661_v32  ;;  %v701_v2 = vadd.f32 %v700_v54, %v699_v44 }
  0xd5   : > { %v610_v37 = vpop.f32.mrf.mxu0 }
  0xd6   : > { %v668_v39 = vrot.slane %v667_v34, 2  ;;  %v706_v40 = vrot.slane %v705_v35, 4  ;;  %v611_v41 = vadd.f32 %v610_v37, %v473_v59  ;;  %v625_v59 = vpop.f32.mrf.mxu2  ;;  %v664_v0 = vmul.f32 0.35355338, %v663_v53 }
  0xd7   : > { %v702_v10 = vrot.slane %v701_v2, 1 }
  0xd8   : > { %v669_v45 = vadd.f32 %v668_v39, %v667_v34  ;;  %v673_v46 = vmul.f32 %v611_v41, %v418_v1  ;;  %v707_v50 = vadd.f32 %v706_v40, %v705_v35  ;;  %v656_v1 = vmul.f32 0.35355338, %v655_v57  ;;  %v498_v35 = vpop.permute.xlu0 %497  ;;  %v640_v40 = vpop.f32.mrf.mxu3 }
  0xd9   : > { %v703_v17 = vadd.f32 %v702_v10, %v701_v2  ;;  %v626_v47 = vadd.f32 %v625_v59, %v498_v35 }
  0xda   : > { %v670_v49 = vrot.slane %v669_v45, 1  ;;  %v674_v51 = vrot.slane %v673_v46, 4  ;;  %v708_v61 = vrot.slane %v707_v50, 2  ;;  %v713_v9 = vmax.f32 %v656_v1, %v664_v0 }
  0xdb   : > { %v704_v24 = vmul.f32 0.35355338, %v703_v17 }
  0xdc   : > { %v675_v56 = vadd.f32 %v674_v51, %v673_v46  ;;  %v671_v60 = vadd.f32 %v670_v49, %v669_v45  ;;  %v709_v6 = vadd.f32 %v708_v61, %v707_v50  ;;  %v508_v45 = vpop.permute.xlu2 %507 }
  0xde   : > { %v676_v62 = vrot.slane %v675_v56, 2  ;;  %v672_v5 = vmul.f32 0.35355338, %v671_v60  ;;  %v710_v14 = vrot.slane %v709_v6, 1  ;;  %v628_v19 = vpop.f32.mrf.mxu2 }
  0xdf   : > { %v629_v50 = vadd.f32 %v628_v19, %v503_v42 }
  0xe0   : > { %v677_v3 = vadd.f32 %v676_v62, %v675_v56  ;;  %v714_v13 = vmax.f32 %v713_v9, %v672_v5  ;;  %v711_v21 = vadd.f32 %v710_v14, %v709_v6  ;;  %v513_v57 = vpop.permute.xlu0 %512 }
  0xe2   : > { %v678_v7 = vrot.slane %v677_v3, 1  ;;  %v712_v26 = vmul.f32 0.35355338, %v711_v21 }
  0xe4   : > { %v679_v11 = vadd.f32 %v678_v7, %v677_v3 }
  0xe6   : > { %v680_v15 = vmul.f32 0.35355338, %v679_v11  ;;  %v631_v33 = vpop.f32.mrf.mxu2  ;;  %v523_v11 = vpop.permute.xlu2 %522 }
  0xe7   : > { %v632_v58 = vadd.f32 %v631_v33, %v508_v45  ;;  %v773_v33 = vstv %s942_s13 }
  0xe8   : > { %v715_v18 = vmax.f32 %v714_v13, %v680_v15 }
  0xea   : > { %v716_v22 = vmax.f32 %v715_v18, %v688_v16 }
  0xec   : > { %v717_v25 = vmax.f32 %v716_v22, %v696_v20  ;;  %v770_v22 = vlaneseq }
  0xee   : > { %v718_v27 = vmax.f32 %v717_v25, %v704_v24  ;;  %v634_v52 = vpop.f32.mrf.mxu2  ;;  %v391_v35 = vpop.permute.xlu2 %390 }
  0xef   : > { %v635_v2 = vadd.f32 %v634_v52, %v513_v57 }
  0xf0   : > { %v719_v28 = vmax.f32 %v718_v27, %v712_v26 }
  0xf2   : > { %v720_v29 = vsub.f32 %v656_v1, %v719_v28  ;;  %v723_v30 = vsub.f32 %v664_v0, %v719_v28  ;;  %v726_v31 = vsub.f32 %v672_v5, %v719_v28  ;;  %v729_v32 = vsub.f32 %v680_v15, %v719_v28  ;;  %v643_v0 = vpop.f32.mrf.mxu3  ;;  %v518_v5 = vpop.permute.xlu1 %517 }
  0xf3   : > { %v732_v34 = vsub.f32 %v688_v16, %v719_v28  ;;  %v735_v41 = vsub.f32 %v696_v20, %v719_v28  ;;  %v738_v44 = vsub.f32 %v704_v24, %v719_v28  ;;  %v741_v48 = vsub.f32 %v712_v26, %v719_v28  ;;  %v528_v20 = vpop.permute.xlu0 %527 }
  0xf4   : > { %v721_v36 = vmul.f32 1.442695, %v720_v29  ;;  %v724_v37 = vmul.f32 1.442695, %v723_v30  ;;  %v727_v38 = vmul.f32 1.442695, %v726_v31  ;;  %v638_v6 = vadd.f32 %v637_v23, %v518_v5 }
  0xf5   : > { %v730_v39 = vmul.f32 1.442695, %v729_v32  ;;  %v733_v43 = vmul.f32 1.442695, %v732_v34  ;;  %v736_v46 = vmul.f32 1.442695, %v735_v41  ;;  %v641_v15 = vadd.f32 %v640_v40, %v523_v11 }
  0xf6   : > { %1015 = vpow2.f32 %v721_v36  ;;  %v739_v54 = vmul.f32 1.442695, %v738_v44  ;;  %v742_v63 = vmul.f32 1.442695, %v741_v48  ;;  %v644_v24 = vadd.f32 %v643_v0, %v528_v20 }
  0xf7   : > { %1017 = vpow2.f32 %v724_v37  ;;  %v771_v30 = vand.u32 127, %v770_v22 }
  0xf8   : > { %1019 = vpow2.f32 %v727_v38 }
  0xf9   : > { %1021 = vpow2.f32 %v730_v39  ;;  %v774_v36 = vadd.s32 %v773_v33, %v771_v30  ;;  %v421_v39 = vadd.f32 %v1341_v55, %v391_v35 }
  0xfa   : > { %1023 = vpow2.f32 %v733_v43  ;;  %v646_v26 = vpop.f32.mrf.mxu3  ;;  %v533_v29 = vpop.permute.xlu1 %532 }
  0xfb   : > { %1025 = vpow2.f32 %v736_v46  ;;  %v647_v31 = vadd.f32 %v646_v26, %v533_v29  ;;  %vm775_vm2 = vcmp.lt.s32.totalorder %v774_v36, 300 }
  0xfc   : > { %v1016_v49 = vpop.eup %1015  ;;  %1027 = vpow2.f32 %v739_v54 }
  0xfd   : > { %v1018_v51 = vpop.eup %1017  ;;  %v752_v53 = vmul.f32 %v1016_v49, %v626_v47  ;;  %1029 = vpow2.f32 %v742_v63 }
  0xfe   : > { %v1020_v56 = vpop.eup %1019  ;;  %v744_v60 = vadd.f32 %v1018_v51, %v1016_v49  ;;  %v753_v61 = vmul.f32 %v1018_v51, %v629_v50 }
  0xff   : > { %v1022_v62 = vpop.eup %1021  ;;  %v755_v1 = vmul.f32 %v1020_v56, %v632_v58 }
 0x100   : > { %v745_v3 = vadd.f32 %v1020_v56, %v744_v60  ;;  %v754_v59 = vadd.f32 %v753_v61, %v752_v53  ;;  %v1024_v4 = vpop.eup %1023  ;;  %v757_v9 = vmul.f32 %v1022_v62, %v635_v2 }
 0x101   : > { %v1026_v10 = vpop.eup %1025  ;;  %v759_v13 = vmul.f32 %v1024_v4, %v638_v6 }
 0x102   : > { %v746_v7 = vadd.f32 %v1022_v62, %v745_v3  ;;  %v756_v8 = vadd.f32 %v755_v1, %v754_v59  ;;  %v1028_v18 = vpop.eup %1027  ;;  %v761_v19 = vmul.f32 %v1026_v10, %v641_v15 }
 0x103   : > { %v1030_v23 = vpop.eup %1029  ;;  %v763_v28 = vmul.f32 %v1028_v18, %v644_v24 }
 0x104   : > { %v758_v12 = vadd.f32 %v757_v9, %v756_v8  ;;  %v747_v14 = vadd.f32 %v1024_v4, %v746_v7  ;;  %v765_v34 = vmul.f32 %v1030_v23, %v647_v31 }
 0x106   : > { %v760_v16 = vadd.f32 %v759_v13, %v758_v12  ;;  %v748_v17 = vadd.f32 %v1026_v10, %v747_v14 }
 0x108   : > { %v749_v21 = vadd.f32 %v1028_v18, %v748_v17  ;;  %v762_v25 = vadd.f32 %v761_v19, %v760_v16 }
 0x10a   : > { %v750_v27 = vadd.f32 %v1030_v23, %v749_v21  ;;  %v764_v32 = vadd.f32 %v763_v28, %v762_v25 }
 0x10c   : > { %1031 = vrcp.f32 %v750_v27  ;;  %v766_v37 = vadd.f32 %v765_v34, %v764_v32 }
 0x112   : > { %v1032_v38 = vpop.eup %1031 }
 0x113   : > { %v767_v40 = vmul.f32 %v1032_v38, %v766_v37 }
 0x115   : > { %v768_v41 = vsub.f32 %v421_v39, %v767_v40 }
 0x117   : > { %v778_v42 = vsel %vm775_vm2, %v768_v41, 0.0  ;;  %769 = vst [vmem:[%s353_s22] sm:$0xff] %v768_v41 }
 0x118   : > { %779 = vadd.xlane.f32.xlu0 %v778_v42  ;;  %v781_v43 = vmul.f32 %v778_v42, %v778_v42 }
 0x119   : > { %1060 = shalt.err (!%p1057_p7)
}
 0x11a   : > { %972 = dma.vmem_to_hbm [thread:$0]  (%p1177_p6), %s806_s23, 128, %s808_s14, %s788_s28   ;;  %782 = vadd.xlane.f32.xlu1 %v781_v43  ;;  %vm784_vm3 = vcmask 7168  }
 0x11b   : > { %s947_s20 = sshll.u32 %s1212_s15, 4 }
 0x11c   : > { %s369_s22 = scalar_lea.vmem %s1389_s7, %s947_s20 }
 0x18b   : > { %v780_v55 = vpop.xlane.xlu0 %779 }
 0x18c   : > { %785 = vst.msk [vmem:[%s369_s22] sm:$0xff] %vm784_vm3, %v780_v55 }
 0x18d   : > { %v783_v44 = vpop.xlane.xlu1 %782 }
 0x18e   : > { %786 = vst.msk [vmem:[%s369_s22 + $0x8] sm:$0xff] %vm784_vm3, %v783_v44 }
 0x18f PF: > { %p978_p9 = scmp.ge.s32.totalorder %s1095_s27, 2  ;;  %s822_s29 = sand.u32 1, %s1083_s24  }
 0x190   : > { %s823_s11 = scalar_lea.sflag [#allocation4], %s822_s29 }
 0x191   : > { %p975_p10 = pnand %p978_p9, %p1181_p8 }
 0x193   : > { %p976_p6 = pneg %p975_p10 }
 0x195   : > { %1078 = dma.done.wait (%p976_p6), %s823_s11, 128  }
 0x196   : > { %1080 = vsyncadd (%p976_p6), %s823_s11, 4294967168  ;;  %p18_p11 = scmp.ge.s32.totalorder %s1163_s30, 5   ;;  %s1392_s24 = smov %s1087_s25 }
 0x197   : > { %s1393_s25 = smov %s1091_s26  ;;  %s1394_s26 = smov %s1175_s10 }
 0x198   : > { %s1395_s27 = smov %s1163_s30  ;;  %20 = sbr.rel (!%p18_p11) target bundleno = 3 (0x3), region = 137 }
 0x19d   :  { %837 = vsyncpa [#allocation4], 1 }
 0x19e   :  { %839 = vsyncpa [#allocation4 + $0x1], 1 }

</bundles_post_ra>
